<compile_context>
chip_gen: v7x
topology: tpu7x:2x2x1
jax: 0.10.0
libtpu: 0.0.40
codegen_flags: <defaults>
</compile_context>

<pallas_src>
import jax
import jax.numpy as jnp
import numpy as np
from jax.experimental import pallas as pl
from jax.experimental.pallas import tpu as pltpu


def elman_kernel(x_ref, w1x_ref, w1h_ref, b1_ref, w2_ref, b2_ref,
                 y_ref, hfin_ref, lin1_ref):
    """Elman forward, single invocation.

    x_ref    : (T*Bp, E)  time-major flattened input; rows [t*Bp,(t+1)*Bp) = timestep t
    w1x_ref  : (E, C)     linear1 weight, input part (pre-transposed)
    w1h_ref  : (C, C)     linear1 weight, hidden part (pre-transposed)
    b1_ref   : (1, C)
    w2_ref   : (C, O)     linear2 weight (pre-transposed)
    b2_ref   : (1, O)
    y_ref    : (T*Bp, O)  time-major flattened outputs
    hfin_ref : (Bp, C)    final hidden state (pre-activation of last step)
    lin1_ref : (T*Bp, C)  VMEM scratch holding all pre-activations
    """
    TB = x_ref.shape[0]
    Bp = hfin_ref.shape[0]
    T = TB // Bp

    # 1) Batched input projection off the serial path (one MXU matmul, M = T*Bp).
    #    Bias broadcast happens exactly once.
    lin1_ref[...] = (
        jnp.dot(x_ref[...], w1x_ref[...], preferred_element_type=jnp.float32)
        + b1_ref[...]
    )

    # 2) Serial recurrence: only h @ W1h is on the critical path.
    #    hidden starts at zeros, so lin1[t=0] == xproj[0] is already correct.
    w1h = w1h_ref[...]
    h = lin1_ref[pl.ds(0, Bp), :]
    for t in range(1, T):                      # T is static -> fully unrolled
        row = t * Bp                           # 8-aligned sublane offset (Bp % 8 == 0)
        h = (jnp.dot(h, w1h, preferred_element_type=jnp.float32)
             + lin1_ref[pl.ds(row, Bp), :])
        lin1_ref[pl.ds(row, Bp), :] = h

    hfin_ref[...] = h

    # 3) Batched output projection + single contiguous writeback.
    act = jax.nn.sigmoid(lin1_ref[...])
    y_ref[...] = (
        jnp.dot(act, w2_ref[...], preferred_element_type=jnp.float32)
        + b2_ref[...]
    )


def elman_forward(x, w1x, w1h, b1, w2, b2):
    B, T, E = x.shape
    C = w1h.shape[0]
    O = w2.shape[1]

    # Pad batch to a full sublane tile (multiple of 8 rows).
    Bp = ((B + 7) // 8) * 8
    if Bp != B:
        x = jnp.pad(x, ((0, Bp - B), (0, 0), (0, 0)))

    # Time-major, flattened layout: row block [t*Bp, (t+1)*Bp) is timestep t.
    x_tm = jnp.transpose(x, (1, 0, 2)).reshape(T * Bp, E)

    def vmem_spec():
        return pl.BlockSpec(memory_space=pltpu.MemorySpace.VMEM)

    y_tm, h_pad = pl.pallas_call(
        elman_kernel,
        out_shape=(
            jax.ShapeDtypeStruct((T * Bp, O), jnp.float32),
            jax.ShapeDtypeStruct((Bp, C), jnp.float32),
        ),
        in_specs=[vmem_spec() for _ in range(6)],
        out_specs=(vmem_spec(), vmem_spec()),
        scratch_shapes=[pltpu.VMEM((T * Bp, C), jnp.float32)],
    )(x_tm, w1x, w1h, b1, w2, b2)

    # Wrapper-side layout plumbing back to (B, T, O) / (B, C).
    y = jnp.transpose(y_tm.reshape(T, Bp, O), (1, 0, 2))[:B]
    return y, h_pad[:B]


def elman_reference(x, w1x, w1h, b1, w2, b2):
    B, T, E = x.shape
    C = w1h.shape[0]
    h = jnp.zeros((B, C), jnp.float32)
    ys = []
    for t in range(T):
        lin1 = x[:, t, :] @ w1x + h @ w1h + b1
        h = lin1
        ys.append((jax.nn.sigmoid(lin1) @ w2 + b2)[:, None, :])
    return jnp.concatenate(ys, axis=1), h


if __name__ == "__main__":
    # Small, consistent shapes: in_features = context_features = out_features = 32
    # (E == C is required for the PyTorch module's hidden=None default to type-check).
    B, T, E = 4, 8, 32
    C, O = 32, 32

    key = jax.random.PRNGKey(0)
    kx, kw1, kb1, kw2, kb2 = jax.random.split(key, 5)

    x = jax.random.normal(kx, (B, T, E), jnp.float32)

    # Deterministic parameter init mimicking torch.nn.Linear (uniform +-1/sqrt(fan_in)).
    bound1 = 1.0 / np.sqrt(E + C)
    w1 = jax.random.uniform(kw1, (E + C, C), jnp.float32, -bound1, bound1)
    b1 = jax.random.uniform(kb1, (1, C), jnp.float32, -bound1, bound1)
    bound2 = 1.0 / np.sqrt(C)
    w2 = jax.random.uniform(kw2, (C, O), jnp.float32, -bound2, bound2)
    b2 = jax.random.uniform(kb2, (1, O), jnp.float32, -bound2, bound2)

    # Split linear1 weight into the x part and the hidden part (concat == split matmul).
    w1x = w1[:E, :]
    w1h = w1[E:, :]

    y, h_final = elman_forward(x, w1x, w1h, b1, w2, b2)
    jax.block_until_ready((y, h_final))

    y_ref, h_ref = elman_reference(x, w1x, w1h, b1, w2, b2)
    np.testing.assert_allclose(np.asarray(y), np.asarray(y_ref), rtol=1e-5, atol=1e-5)
    np.testing.assert_allclose(np.asarray(h_final), np.asarray(h_ref), rtol=1e-5, atol=1e-5)

    print("KERNEL_OK")
</pallas_src>

<mosaic_0001>
module attributes {stable_mosaic.version = 11 : i64} {
  func.func @elman_kernel(%arg0: memref<64x32xf32, #tpu.memory_space<vmem>>, %arg1: memref<32x32xf32, #tpu.memory_space<vmem>>, %arg2: memref<32x32xf32, #tpu.memory_space<vmem>>, %arg3: memref<1x32xf32, #tpu.memory_space<vmem>>, %arg4: memref<32x32xf32, #tpu.memory_space<vmem>>, %arg5: memref<1x32xf32, #tpu.memory_space<vmem>>, %arg6: memref<64x32xf32, #tpu.memory_space<vmem>>, %arg7: memref<8x32xf32, #tpu.memory_space<vmem>>, %arg8: memref<64x32xf32, #tpu.memory_space<vmem>>) attributes {dimension_semantics = [], scalar_prefetch = 0 : i64, scratch_operands = 1 : i64, tpu.core_type = #tpu.core_type<tc>} {
    %c0 = arith.constant 0 : index
    %c0_0 = arith.constant 0 : index
    %0 = vector.load %arg0[%c0, %c0_0] : memref<64x32xf32, #tpu.memory_space<vmem>>, vector<64x32xf32>
    %c0_1 = arith.constant 0 : index
    %c0_2 = arith.constant 0 : index
    %1 = vector.load %arg1[%c0_1, %c0_2] : memref<32x32xf32, #tpu.memory_space<vmem>>, vector<32x32xf32>
    %cst = arith.constant dense<0.000000e+00> : vector<64x32xf32>
    %2 = tpu.matmul %0, %1, %cst {dimension_numbers = #tpu.dot_dimension_numbers<[1], [0], [0], [1], [0, 0, 1, 1], [], []>} : vector<64x32xf32>, vector<32x32xf32>, vector<64x32xf32> -> vector<64x32xf32>
    %c0_3 = arith.constant 0 : index
    %c0_4 = arith.constant 0 : index
    %3 = vector.load %arg3[%c0_3, %c0_4] : memref<1x32xf32, #tpu.memory_space<vmem>>, vector<1x32xf32>
    %4 = vector.broadcast %3 : vector<1x32xf32> to vector<64x32xf32>
    %5 = arith.addf %2, %4 : vector<64x32xf32>
    %c0_5 = arith.constant 0 : index
    %c0_6 = arith.constant 0 : index
    %6 = vector.load %arg8[%c0_5, %c0_6] : memref<64x32xf32, #tpu.memory_space<vmem>>, vector<64x32xf32>
    tpu.vector_store %arg8[%c0_5, %c0_6], %5 {strides = array<i32>} : memref<64x32xf32, #tpu.memory_space<vmem>>, vector<64x32xf32>,
    %c0_7 = arith.constant 0 : index
    %c0_8 = arith.constant 0 : index
    %7 = vector.load %arg2[%c0_7, %c0_8] : memref<32x32xf32, #tpu.memory_space<vmem>>, vector<32x32xf32>
    %c0_9 = arith.constant 0 : index
    %c0_10 = arith.constant 0 : index
    %8 = vector.load %arg8[%c0_9, %c0_10] : memref<64x32xf32, #tpu.memory_space<vmem>>, vector<8x32xf32>
    %cst_11 = arith.constant dense<0.000000e+00> : vector<8x32xf32>
    %9 = tpu.matmul %8, %7, %cst_11 {dimension_numbers = #tpu.dot_dimension_numbers<[1], [0], [0], [1], [0, 0, 1, 1], [], []>} : vector<8x32xf32>, vector<32x32xf32>, vector<8x32xf32> -> vector<8x32xf32>
    %c8 = arith.constant 8 : index
    %c0_12 = arith.constant 0 : index
    %10 = vector.load %arg8[%c8, %c0_12] : memref<64x32xf32, #tpu.memory_space<vmem>>, vector<8x32xf32>
    %11 = arith.addf %9, %10 : vector<8x32xf32>
    %c8_13 = arith.constant 8 : index
    %c0_14 = arith.constant 0 : index
    %12 = vector.load %arg8[%c8_13, %c0_14] : memref<64x32xf32, #tpu.memory_space<vmem>>, vector<8x32xf32>
    tpu.vector_store %arg8[%c8_13, %c0_14], %11 {strides = array<i32>} : memref<64x32xf32, #tpu.memory_space<vmem>>, vector<8x32xf32>,
    %cst_15 = arith.constant dense<0.000000e+00> : vector<8x32xf32>
    %13 = tpu.matmul %11, %7, %cst_15 {dimension_numbers = #tpu.dot_dimension_numbers<[1], [0], [0], [1], [0, 0, 1, 1], [], []>} : vector<8x32xf32>, vector<32x32xf32>, vector<8x32xf32> -> vector<8x32xf32>
    %c16 = arith.constant 16 : index
    %c0_16 = arith.constant 0 : index
    %14 = vector.load %arg8[%c16, %c0_16] : memref<64x32xf32, #tpu.memory_space<vmem>>, vector<8x32xf32>
    %15 = arith.addf %13, %14 : vector<8x32xf32>
    %c16_17 = arith.constant 16 : index
    %c0_18 = arith.constant 0 : index
    %16 = vector.load %arg8[%c16_17, %c0_18] : memref<64x32xf32, #tpu.memory_space<vmem>>, vector<8x32xf32>
    tpu.vector_store %arg8[%c16_17, %c0_18], %15 {strides = array<i32>} : memref<64x32xf32, #tpu.memory_space<vmem>>, vector<8x32xf32>,
    %cst_19 = arith.constant dense<0.000000e+00> : vector<8x32xf32>
    %17 = tpu.matmul %15, %7, %cst_19 {dimension_numbers = #tpu.dot_dimension_numbers<[1], [0], [0], [1], [0, 0, 1, 1], [], []>} : vector<8x32xf32>, vector<32x32xf32>, vector<8x32xf32> -> vector<8x32xf32>
    %c24 = arith.constant 24 : index
    %c0_20 = arith.constant 0 : index
    %18 = vector.load %arg8[%c24, %c0_20] : memref<64x32xf32, #tpu.memory_space<vmem>>, vector<8x32xf32>
    %19 = arith.addf %17, %18 : vector<8x32xf32>
    %c24_21 = arith.constant 24 : index
    %c0_22 = arith.constant 0 : index
    %20 = vector.load %arg8[%c24_21, %c0_22] : memref<64x32xf32, #tpu.memory_space<vmem>>, vector<8x32xf32>
    tpu.vector_store %arg8[%c24_21, %c0_22], %19 {strides = array<i32>} : memref<64x32xf32, #tpu.memory_space<vmem>>, vector<8x32xf32>,
    %cst_23 = arith.constant dense<0.000000e+00> : vector<8x32xf32>
    %21 = tpu.matmul %19, %7, %cst_23 {dimension_numbers = #tpu.dot_dimension_numbers<[1], [0], [0], [1], [0, 0, 1, 1], [], []>} : vector<8x32xf32>, vector<32x32xf32>, vector<8x32xf32> -> vector<8x32xf32>
    %c32 = arith.constant 32 : index
    %c0_24 = arith.constant 0 : index
    %22 = vector.load %arg8[%c32, %c0_24] : memref<64x32xf32, #tpu.memory_space<vmem>>, vector<8x32xf32>
    %23 = arith.addf %21, %22 : vector<8x32xf32>
    %c32_25 = arith.constant 32 : index
    %c0_26 = arith.constant 0 : index
    %24 = vector.load %arg8[%c32_25, %c0_26] : memref<64x32xf32, #tpu.memory_space<vmem>>, vector<8x32xf32>
    tpu.vector_store %arg8[%c32_25, %c0_26], %23 {strides = array<i32>} : memref<64x32xf32, #tpu.memory_space<vmem>>, vector<8x32xf32>,
    %cst_27 = arith.constant dense<0.000000e+00> : vector<8x32xf32>
    %25 = tpu.matmul %23, %7, %cst_27 {dimension_numbers = #tpu.dot_dimension_numbers<[1], [0], [0], [1], [0, 0, 1, 1], [], []>} : vector<8x32xf32>, vector<32x32xf32>, vector<8x32xf32> -> vector<8x32xf32>
    %c40 = arith.constant 40 : index
    %c0_28 = arith.constant 0 : index
    %26 = vector.load %arg8[%c40, %c0_28] : memref<64x32xf32, #tpu.memory_space<vmem>>, vector<8x32xf32>
    %27 = arith.addf %25, %26 : vector<8x32xf32>
    %c40_29 = arith.constant 40 : index
    %c0_30 = arith.constant 0 : index
    %28 = vector.load %arg8[%c40_29, %c0_30] : memref<64x32xf32, #tpu.memory_space<vmem>>, vector<8x32xf32>
    tpu.vector_store %arg8[%c40_29, %c0_30], %27 {strides = array<i32>} : memref<64x32xf32, #tpu.memory_space<vmem>>, vector<8x32xf32>,
    %cst_31 = arith.constant dense<0.000000e+00> : vector<8x32xf32>
    %29 = tpu.matmul %27, %7, %cst_31 {dimension_numbers = #tpu.dot_dimension_numbers<[1], [0], [0], [1], [0, 0, 1, 1], [], []>} : vector<8x32xf32>, vector<32x32xf32>, vector<8x32xf32> -> vector<8x32xf32>
    %c48 = arith.constant 48 : index
    %c0_32 = arith.constant 0 : index
    %30 = vector.load %arg8[%c48, %c0_32] : memref<64x32xf32, #tpu.memory_space<vmem>>, vector<8x32xf32>
    %31 = arith.addf %29, %30 : vector<8x32xf32>
    %c48_33 = arith.constant 48 : index
    %c0_34 = arith.constant 0 : index
    %32 = vector.load %arg8[%c48_33, %c0_34] : memref<64x32xf32, #tpu.memory_space<vmem>>, vector<8x32xf32>
    tpu.vector_store %arg8[%c48_33, %c0_34], %31 {strides = array<i32>} : memref<64x32xf32, #tpu.memory_space<vmem>>, vector<8x32xf32>,
    %cst_35 = arith.constant dense<0.000000e+00> : vector<8x32xf32>
    %33 = tpu.matmul %31, %7, %cst_35 {dimension_numbers = #tpu.dot_dimension_numbers<[1], [0], [0], [1], [0, 0, 1, 1], [], []>} : vector<8x32xf32>, vector<32x32xf32>, vector<8x32xf32> -> vector<8x32xf32>
    %c56 = arith.constant 56 : index
    %c0_36 = arith.constant 0 : index
    %34 = vector.load %arg8[%c56, %c0_36] : memref<64x32xf32, #tpu.memory_space<vmem>>, vector<8x32xf32>
    %35 = arith.addf %33, %34 : vector<8x32xf32>
    %c56_37 = arith.constant 56 : index
    %c0_38 = arith.constant 0 : index
    %36 = vector.load %arg8[%c56_37, %c0_38] : memref<64x32xf32, #tpu.memory_space<vmem>>, vector<8x32xf32>
    tpu.vector_store %arg8[%c56_37, %c0_38], %35 {strides = array<i32>} : memref<64x32xf32, #tpu.memory_space<vmem>>, vector<8x32xf32>,
    %c0_39 = arith.constant 0 : index
    %c0_40 = arith.constant 0 : index
    %37 = vector.load %arg7[%c0_39, %c0_40] : memref<8x32xf32, #tpu.memory_space<vmem>>, vector<8x32xf32>
    tpu.vector_store %arg7[%c0_39, %c0_40], %35 {strides = array<i32>} : memref<8x32xf32, #tpu.memory_space<vmem>>, vector<8x32xf32>,
    %c0_41 = arith.constant 0 : index
    %c0_42 = arith.constant 0 : index
    %38 = vector.load %arg8[%c0_41, %c0_42] : memref<64x32xf32, #tpu.memory_space<vmem>>, vector<64x32xf32>
    %39 = arith.negf %38 : vector<64x32xf32>
    %40 = math.exp %39 : vector<64x32xf32>
    %cst_43 = arith.constant 1.000000e+00 : f32
    %41 = vector.broadcast %cst_43 : f32 to vector<64x32xf32>
    %42 = arith.addf %41, %40 : vector<64x32xf32>
    %43 = arith.divf %41, %42 : vector<64x32xf32>
    %c0_44 = arith.constant 0 : index
    %c0_45 = arith.constant 0 : index
    %44 = vector.load %arg4[%c0_44, %c0_45] : memref<32x32xf32, #tpu.memory_space<vmem>>, vector<32x32xf32>
    %cst_46 = arith.constant dense<0.000000e+00> : vector<64x32xf32>
    %45 = tpu.matmul %43, %44, %cst_46 {dimension_numbers = #tpu.dot_dimension_numbers<[1], [0], [0], [1], [0, 0, 1, 1], [], []>} : vector<64x32xf32>, vector<32x32xf32>, vector<64x32xf32> -> vector<64x32xf32>
    %c0_47 = arith.constant 0 : index
    %c0_48 = arith.constant 0 : index
    %46 = vector.load %arg5[%c0_47, %c0_48] : memref<1x32xf32, #tpu.memory_space<vmem>>, vector<1x32xf32>
    %47 = vector.broadcast %46 : vector<1x32xf32> to vector<64x32xf32>
    %48 = arith.addf %45, %47 : vector<64x32xf32>
    %c0_49 = arith.constant 0 : index
    %c0_50 = arith.constant 0 : index
    %49 = vector.load %arg6[%c0_49, %c0_50] : memref<64x32xf32, #tpu.memory_space<vmem>>, vector<64x32xf32>
    tpu.vector_store %arg6[%c0_49, %c0_50], %48 {strides = array<i32>} : memref<64x32xf32, #tpu.memory_space<vmem>>, vector<64x32xf32>,
    return
  }
}

</mosaic_0001>

<bundles_post_ra>
// kernel: tpu_custom_call.1
= control target key start
LH: loop header
LB: loop body
LE: loop exit
PB: predicated region body
PF: predicated region fallthrough
CT: control target
= control target key end

     0   :  { %vm45_vm0 = vcmask 261120   ;;  %v1263_v6 = vmov 0.0|0.0   ;;  %s1506_s0 = inlined_call_operand.vmem [shape: f32[64,32], index: 0, kind: input, shape index: {}]   ;;  %s1507_s1 = inlined_call_operand.vmem [shape: f32[32,32], index: 1, kind: input, shape index: {}]   ;;  %s1508_s2 = inlined_call_operand.vmem [shape: f32[32,32], index: 2, kind: input, shape index: {}]   ;;  %s1509_s3 = inlined_call_operand.vmem [shape: f32[1,32], index: 3, kind: input, shape index: {}]   ;;  %s1510_s4 = inlined_call_operand.vmem [shape: f32[32,32], index: 4, kind: input, shape index: {}]   ;;  %s1511_s5 = inlined_call_operand.vmem [shape: f32[1,32], index: 5, kind: input, shape index: {}]   ;;  %s1512_s6 = inlined_call_operand.vmem [shape: f32[64,32], index: 6, kind: output, shape index: {0}]   ;;  %s1513_s7 = inlined_call_operand.hbm [shape: f32[8,32], index: 7, kind: output, shape index: {1}]  }
   0x1   :  { %v34_v0 = vld [vmem:[%s1507_s1] sm:$0xff]  ;;  %v35_v1 = vld [vmem:[%s1507_s1 + $0x8] sm:$0xff]  ;;  %v36_v2 = vld [vmem:[%s1507_s1 + $0x10] sm:$0xff]  ;;  %1159 = vmatprep.subr.bf16.mxu1 %v1263_v6 }
   0x2   :  { %v1145_v3 = vpack.c.bf16 %v35_v1, %v34_v0  ;;  %v37_v4 = vld [vmem:[%s1507_s1 + $0x18] sm:$0xff]  ;;  %v26_v5 = vld [vmem:[%s1506_s0] sm:$0xff]  ;;  %v184_v9 = vld [vmem:[%s1508_s2 + $0x8] sm:$0xff] }
   0x3   :  { %v1149_v7 = vpack.c.bf16 %v37_v4, %v36_v2  ;;  %1036 = vmatprep.mubr.msk.f32.mxu0 %vm45_vm0, %v26_v5  ;;  %v183_v8 = vld [vmem:[%s1508_s2] sm:$0xff] }
   0x4   :  { %1146 = vmatprep.subr.bf16.mxu0 %v1145_v3  ;;  %v1330_v10 = vpack.c.bf16 %v184_v9, %v183_v8 }
   0x5   :  { %13 = vsyncpa [#allocation4], 0  ;;  %1148 = vmatpush3.bf16.msra.mxu0 %v1145_v3  ;;  %v27_v11 = vld [vmem:[%s1506_s0 + $0x8] sm:$0xff]  ;;  %v28_v12 = vld [vmem:[%s1506_s0 + $0x10] sm:$0xff]  ;;  %vm1264_vm1 = vmmov 0   ;;  %v1265_v21 = vmov 0.0  }
   0x6   :  { %1150 = vmatprep.subr.bf16.mxu0 %v1149_v7  ;;  %1161 = vmatpush3.bf16.msra.mxu1 %v1330_v10  ;;  %v29_v13 = vld [vmem:[%s1506_s0 + $0x18] sm:$0xff]  ;;  %v30_v14 = vld [vmem:[%s1506_s0 + $0x20] sm:$0xff]  ;;  %v31_v15 = vld [vmem:[%s1506_s0 + $0x28] sm:$0xff]  ;;  %s1266_s27 = smov [#allocation3]  }
   0x7   :  { %1162 = vmatprep.subr.bf16.mxu1 %v1263_v6  ;;  %v32_v16 = vld [vmem:[%s1506_s0 + $0x30] sm:$0xff]  ;;  %v186_v18 = vld [vmem:[%s1508_s2 + $0x18] sm:$0xff]  ;;  %1067 = vmatprep.mubr.msk.f32.mxu1 %vm1264_vm1, %v1265_v21  ;;  %v936_v22 = vld [vmem:[%s1509_s3] ss:$0 sm:$0xff]  ;;  %s926_s28 = sshll.u32 %s1266_s27, 4  ;;  %s927_s28 = int_to_ptr.vmem [resolvable:$true] %s926_s28 }
   0x8   :  { %v185_v17 = vld [vmem:[%s1508_s2 + $0x10] sm:$0xff]  ;;  %v33_v19 = vld [vmem:[%s1506_s0 + $0x38] sm:$0xff]  ;;  %v770_v56 = vld [vmem:[%s1510_s4] sm:$0xff]  ;;  %s1239_s29 = scalar_lea.vmem %s927_s28, 128  ;;  %p1244_p1 = scmp.lt.s32.totalorder %s927_s28, %s927_s28 }
   0x9   :  { %1152 = vmatpush3.bf16.msra.mxu0 %v1149_v7  ;;  %v1370_v20 = vpack.c.bf16 %v186_v18, %v185_v17  ;;  %v771_v57 = vld [vmem:[%s1510_s4 + $0x8] sm:$0xff]  ;;  %p1240_p0 = scmp.ne.s32.totalorder %s927_s28, %s1239_s29  ;;  %p1245_p2 = scmp.lt.s32.totalorder %s1239_s29, %s1239_s29 }
   0xa   :  { %1153 = vmatprep.subr.bf16.mxu0 %v1263_v6  ;;  %v1195_v58 = vpack.c.bf16 %v771_v57, %v770_v56 }
   0xb   :  { %1164 = vmatpush3.bf16.msra.mxu1 %v1370_v20  ;;  %p1246_p3 = por %p1245_p2, %p1244_p1 }
   0xc   :  { %1037 = vmatmul.mubr.msk.f32.vlgmr.msra.gmra.mrb[0].mxu0 %vm45_vm0, %v27_v11  ;;  %1171 = vmatprep.subr.bf16.mxu1 %v1263_v6 }
   0xd   :  { %1155 = vmatpush3.bf16.msra.mxu0 %v1330_v10  ;;  %1039 = vmatprep.mubr.msk.f32.mxu0 %vm45_vm0, %v28_v12  ;;  %v772_v12 = vld [vmem:[%s1510_s4 + $0x10] sm:$0xff]  ;;  %p1247_p4 = pnand %p1246_p3, %p1240_p0 }
   0xe   :  { %1156 = vmatprep.subr.bf16.mxu0 %v1263_v6 }
  0x10   :  { %1040 = vmatmul.mubr.msk.f32.gmra.mrb[2].mxu0 %vm45_vm0, %v29_v13  ;;  %v773_v13 = vld [vmem:[%s1510_s4 + $0x18] sm:$0xff] }
  0x11   :  { %1042 = vmatprep.mubr.msk.f32.mxu0 %vm45_vm0, %v30_v14  ;;  %1158 = vmatpush3.bf16.msra.mxu0 %v1370_v20 }
  0x12   :  { %1165 = vmatprep.subr.bf16.mxu0 %v1263_v6 }
  0x14   :  { %1043 = vmatmul.mubr.msk.f32.gmra.mrb[4].mxu0 %vm45_vm0, %v31_v15 }
  0x15   :  { %1045 = vmatprep.mubr.msk.f32.mxu0 %vm45_vm0, %v32_v16 }
  0x18   :  { %1046 = vmatmul.mubr.msk.f32.gmra.mrb[6].mxu0 %vm45_vm0, %v33_v19 }
  0x19   :  { %1056 = vmatprep.mubr.msk.f32.mxu0 %vm1264_vm1, %v1265_v21 }
  0xdf   :  { %v1038_v23 = vpop.f32.mrb[0].mxu0 }
  0xe0   :  { %v142_v24 = vadd.f32 %v1038_v23, %v936_v22  ;;  %v136_v25 = vpop.f32.mrb[1].mxu0 }
  0xe1   :  { %v137_v26 = vadd.f32 %v936_v22, %v136_v25 }
  0xe2   :  { %176 = vst.msk [vmem:[#allocation2 + $0x8] sm:$0xff] %vm45_vm0, %v142_v24 }
  0xe3   :  { %175 = vst.msk [vmem:[#allocation2] sm:$0xff] %vm45_vm0, %v137_v26  ;;  %v1041_v27 = vpop.f32.mrb[2].mxu0 }
  0xe4   :  { %v152_v28 = vadd.f32 %v1041_v27, %v936_v22  ;;  %v146_v29 = vpop.f32.mrb[3].mxu0 }
  0xe5   :  { %v147_v30 = vadd.f32 %v936_v22, %v146_v29 }
  0xe6   :  { %178 = vst.msk [vmem:[#allocation2 + $0x18] sm:$0xff] %vm45_vm0, %v152_v28 }
  0xe7   :  { %177 = vst.msk [vmem:[#allocation2 + $0x10] sm:$0xff] %vm45_vm0, %v147_v30  ;;  %v1044_v32 = vpop.f32.mrb[4].mxu0 }
  0xe8   :  { %v162_v33 = vadd.f32 %v1044_v32, %v936_v22  ;;  %v156_v34 = vpop.f32.mrb[5].mxu0 }
  0xe9   :  { %v157_v35 = vadd.f32 %v936_v22, %v156_v34  ;;  %v188_v40 = vld [vmem:[#allocation2 + $0x8] sm:$0xff] }
  0xea   :  { %v1388_v31 = vld [vmem:[#allocation2] sm:$0xff]  ;;  %180 = vst.msk [vmem:[#allocation2 + $0x28] sm:$0xff] %vm45_vm0, %v162_v33 }
  0xeb   :  { %1057 = vmatmul.mubr.msk.f32.vlgmr.msra.gmra.mrb[8].mxu0 %vm45_vm0, %v1388_v31  ;;  %179 = vst.msk [vmem:[#allocation2 + $0x20] sm:$0xff] %vm45_vm0, %v157_v35  ;;  %v1047_v36 = vpop.f32.mrb[6].mxu0  ;;  %v952_v59 = vmul.f32 -1.442695, %v1388_v31  ;;  %v960_v35 = vld [vmem:[%s1511_s5] ss:$0 sm:$0xff] }
  0xec   :  { %1167 = vmatpush3.bf16.msra.mxu0 %v1330_v10  ;;  %1078 = vmatprep.mubr.msk.f32.mxu0 %vm1264_vm1, %v1265_v21  ;;  %v172_v37 = vadd.f32 %v1047_v36, %v936_v22  ;;  %v166_v38 = vpop.f32.mrb[7].mxu0 }
  0xed   :  { %1168 = vmatprep.subr.bf16.mxu0 %v1263_v6  ;;  %v167_v39 = vadd.f32 %v936_v22, %v166_v38  ;;  %v338_v48 = vld [vmem:[#allocation2 + $0x18] sm:$0xff]  ;;  %1207 = vpow2.f32 %v952_v59 }
  0xee   :  { %182 = vst.msk [vmem:[#allocation2 + $0x38] sm:$0xff] %vm45_vm0, %v172_v37  ;;  %v263_v44 = vld [vmem:[#allocation2 + $0x10] sm:$0xff] }
  0xef   :  { %181 = vst.msk [vmem:[#allocation2 + $0x30] sm:$0xff] %vm45_vm0, %v167_v39 }
  0xf0   :  { %1170 = vmatpush3.bf16.msra.mxu0 %v1370_v20 }
  0xf1   :  { %1177 = vmatprep.subr.bf16.mxu0 %v1263_v6  ;;  %v488_v15 = vld [vmem:[#allocation2 + $0x28] sm:$0xff] }
  0xf2   :  { %v413_v52 = vld [vmem:[#allocation2 + $0x20] sm:$0xff] }
  0xf6   :  { %v563_v31 = vld [vmem:[#allocation2 + $0x30] sm:$0xff] }
  0xf7   :  { %v1208_v4 = vpop.eup %1207 }
  0xf8   :  { %v746_v5 = vadd.f32 1.0, %v1208_v4 }
 0x1be   :  { %v258_v41 = vpop.f32.mrb[8].mxu0 }
 0x1bf   :  { %v259_v42 = vadd.f32 %v258_v41, %v188_v40  ;;  %v1058_v43 = vpop.f32.mrb[9].mxu0 }
 0x1c1   :  { %262 = vst.msk [vmem:[#allocation2 + $0x8] sm:$0xff] %vm45_vm0, %v259_v42  ;;  %1068 = vmatmul.mubr.msk.f32.vlgmr.msra.gmra.mrb[0].mxu1 %vm45_vm0, %v259_v42 }
 0x1c2   :  { %1173 = vmatpush3.bf16.msra.mxu1 %v1330_v10  ;;  %1089 = vmatprep.mubr.msk.f32.mxu1 %vm1264_vm1, %v1265_v21 }
 0x1c3   :  { %1174 = vmatprep.subr.bf16.mxu1 %v1263_v6 }
 0x1c6   :  { %1176 = vmatpush3.bf16.msra.mxu1 %v1370_v20 }
 0x1c7   :  { %1183 = vmatprep.subr.bf16.mxu1 %v1263_v6 }
 0x1c8   :  { %v715_v60 = vld [vmem:[#allocation2 + $0x8] sm:$0xff] }
 0x1c9   :  { %v953_v62 = vmul.f32 -1.442695, %v715_v60 }
 0x1cb   :  { %1209 = vpow2.f32 %v953_v62 }
 0x294   :  { %v333_v45 = vpop.f32.mrb[0].mxu1 }
 0x295   :  { %v334_v46 = vadd.f32 %v333_v45, %v263_v44  ;;  %v1069_v47 = vpop.f32.mrb[1].mxu1 }
 0x297   :  { %337 = vst.msk [vmem:[#allocation2 + $0x10] sm:$0xff] %vm45_vm0, %v334_v46  ;;  %1079 = vmatmul.mubr.msk.f32.vlgmr.msra.gmra.mrb[10].mxu0 %vm45_vm0, %v334_v46 }
 0x298   :  { %1179 = vmatpush3.bf16.msra.mxu0 %v1330_v10  ;;  %1100 = vmatprep.mubr.msk.f32.mxu0 %vm1264_vm1, %v1265_v21 }
 0x299   :  { %1180 = vmatprep.subr.bf16.mxu0 %v1263_v6 }
 0x29c   :  { %1182 = vmatpush3.bf16.msra.mxu0 %v1370_v20 }
 0x29d   :  { %1189 = vmatprep.subr.bf16.mxu0 %v1263_v6 }
 0x29e   :  { %v716_v61 = vld [vmem:[#allocation2 + $0x10] sm:$0xff] }
 0x29f   :  { %v954_v63 = vmul.f32 -1.442695, %v716_v61 }
 0x2a1   :  { %1211 = vpow2.f32 %v954_v63 }
 0x36a   :  { %v408_v49 = vpop.f32.mrb[10].mxu0 }
 0x36b   :  { %v409_v50 = vadd.f32 %v408_v49, %v338_v48  ;;  %v1080_v51 = vpop.f32.mrb[11].mxu0 }
 0x36d   :  { %412 = vst.msk [vmem:[#allocation2 + $0x18] sm:$0xff] %vm45_vm0, %v409_v50  ;;  %1090 = vmatmul.mubr.msk.f32.vlgmr.msra.gmra.mrb[2].mxu1 %vm45_vm0, %v409_v50 }
 0x36e   :  { %1185 = vmatpush3.bf16.msra.mxu1 %v1330_v10  ;;  %1111 = vmatprep.mubr.msk.f32.mxu1 %vm1264_vm1, %v1265_v21 }
 0x36f   :  { %1186 = vmatprep.subr.bf16.mxu1 %v1263_v6 }
 0x372   :  { %1188 = vmatpush3.bf16.msra.mxu1 %v1370_v20 }
 0x373   :  { %1196 = vmatprep.subr.bf16.mxu1 %v1195_v58 }
 0x374   :  { %v717_v0 = vld [vmem:[#allocation2 + $0x18] sm:$0xff] }
 0x375   :  { %v955_v2 = vmul.f32 -1.442695, %v717_v0 }
 0x377   :  { %1213 = vpow2.f32 %v955_v2 }
 0x440   :  { %v483_v53 = vpop.f32.mrb[2].mxu1 }
 0x441   :  { %v484_v54 = vadd.f32 %v483_v53, %v413_v52  ;;  %v1091_v55 = vpop.f32.mrb[3].mxu1  ;;  %v638_v53 = vld [vmem:[#allocation2 + $0x38] sm:$0xff] }
 0x443   :  { %487 = vst.msk [vmem:[#allocation2 + $0x20] sm:$0xff] %vm45_vm0, %v484_v54  ;;  %1101 = vmatmul.mubr.msk.f32.vlgmr.msra.gmra.mrb[12].mxu0 %vm45_vm0, %v484_v54 }
 0x444   :  { %1191 = vmatpush3.bf16.msra.mxu0 %v1330_v10  ;;  %1122 = vmatprep.mubr.msk.f32.mxu0 %vm1264_vm1, %v1265_v21 }
 0x445   :  { %1192 = vmatprep.subr.bf16.mxu0 %v1263_v6  ;;  %v1210_v6 = vpop.eup %1209 }
 0x446   :  { %v1212_v7 = vpop.eup %1211  ;;  %v747_v8 = vadd.f32 1.0, %v1210_v6 }
 0x447   :  { %v1214_v9 = vpop.eup %1213  ;;  %v748_v10 = vadd.f32 1.0, %v1212_v7 }
 0x448   :  { %1194 = vmatpush3.bf16.msra.mxu0 %v1370_v20  ;;  %v749_v14 = vadd.f32 1.0, %v1214_v9  ;;  %v1199_v20 = vpack.c.bf16 %v773_v13, %v772_v12 }
 0x44a   :  { %v718_v1 = vld [vmem:[#allocation2 + $0x20] sm:$0xff] }
 0x44b   :  { %v956_v3 = vmul.f32 -1.442695, %v718_v1 }
 0x44d   :  { %1215 = vpow2.f32 %v956_v3 }
 0x44e   :  { %1217 = vrcp.f32 %v746_v5 }
 0x44f   :  { %1219 = vrcp.f32 %v747_v8 }
 0x450   :  { %1221 = vrcp.f32 %v748_v10 }
 0x451   :  { %1223 = vrcp.f32 %v749_v14 }
 0x457   :  { %v1216_v11 = vpop.eup %1215 }
 0x458   :  { %v750_v17 = vadd.f32 1.0, %v1216_v11  ;;  %v1218_v21 = vpop.eup %1217 }
 0x459   :  { %v1220_v22 = vpop.eup %1219 }
 0x45a   :  { %1225 = vrcp.f32 %v750_v17  ;;  %v1222_v24 = vpop.eup %1221 }
 0x45b   :  { %v1224_v26 = vpop.eup %1223 }
 0x464   :  { %v1226_v27 = vpop.eup %1225 }
 0x516   :  { %v558_v16 = vpop.f32.mrb[12].mxu0 }
 0x517   :  { %v559_v18 = vadd.f32 %v558_v16, %v488_v15  ;;  %v1102_v19 = vpop.f32.mrb[13].mxu0 }
 0x519   :  { %562 = vst.msk [vmem:[#allocation2 + $0x28] sm:$0xff] %vm45_vm0, %v559_v18  ;;  %1112 = vmatmul.mubr.msk.f32.vlgmr.msra.gmra.mrb[4].mxu1 %vm45_vm0, %v559_v18 }
 0x51a   :  { %1198 = vmatpush3.bf16.msra.mxu1 %v1195_v58  ;;  %1133 = vmatprep.mubr.msk.f32.mxu1 %vm45_vm0, %v1218_v21 }
 0x51b   :  { %1200 = vmatprep.subr.bf16.mxu1 %v1199_v20 }
 0x51e   :  { %1202 = vmatpush3.bf16.msra.mxu1 %v1199_v20 }
 0x520   :  { %v719_v23 = vld [vmem:[#allocation2 + $0x28] sm:$0xff] }
 0x521   :  { %v957_v25 = vmul.f32 -1.442695, %v719_v23  ;;  %1134 = vmatmul.mubr.msk.f32.vlgmr.msra.gmra.mrb[6].mxu1 %vm45_vm0, %v1220_v22 }
 0x522   :  { %1136 = vmatprep.mubr.msk.f32.mxu1 %vm45_vm0, %v1222_v24 }
 0x523   :  { %1227 = vpow2.f32 %v957_v25 }
 0x525   :  { %1137 = vmatmul.mubr.msk.f32.gmra.mrb[8].mxu1 %vm45_vm0, %v1224_v26 }
 0x526   :  { %1139 = vmatprep.mubr.msk.f32.mxu1 %vm45_vm0, %v1226_v27 }
 0x52d   :  { %v1228_v28 = vpop.eup %1227 }
 0x52e   :  { %v751_v29 = vadd.f32 1.0, %v1228_v28 }
 0x530   :  { %1229 = vrcp.f32 %v751_v29 }
 0x53a   :  { %v1230_v30 = vpop.eup %1229 }
 0x53b   :  { %1140 = vmatmul.mubr.msk.f32.gmra.mrb[10].mxu1 %vm45_vm0, %v1230_v30 }
 0x5ec   :  { %v633_v32 = vpop.f32.mrb[4].mxu1 }
 0x5ed   :  { %v634_v33 = vadd.f32 %v633_v32, %v563_v31  ;;  %v1113_v34 = vpop.f32.mrb[5].mxu1 }
 0x5ef   :  { %637 = vst.msk [vmem:[#allocation2 + $0x30] sm:$0xff] %vm45_vm0, %v634_v33  ;;  %1123 = vmatmul.mubr.msk.f32.vlgmr.msra.gmra.mrb[14].mxu0 %vm45_vm0, %v634_v33 }
 0x5f4   :  { %v1135_v36 = vpop.f32.mrb[6].mxu1 }
 0x5f5   :  { %v877_v37 = vadd.f32 %v1135_v36, %v960_v35  ;;  %v871_v38 = vpop.f32.mrb[7].mxu1 }
 0x5f6   :  { %v720_v39 = vld [vmem:[#allocation2 + $0x30] sm:$0xff]  ;;  %v872_v40 = vadd.f32 %v960_v35, %v871_v38 }
 0x5f7   :  { %v958_v41 = vmul.f32 -1.442695, %v720_v39  ;;  %911 = vst.msk [vmem:[%s1512_s6 + $0x8] sm:$0xff] %vm45_vm0, %v877_v37 }
 0x5f8   :  { %910 = vst.msk [vmem:[%s1512_s6] sm:$0xff] %vm45_vm0, %v872_v40  ;;  %v1138_v42 = vpop.f32.mrb[8].mxu1 }
 0x5f9   :  { %1231 = vpow2.f32 %v958_v41  ;;  %v887_v43 = vadd.f32 %v1138_v42, %v960_v35  ;;  %v881_v44 = vpop.f32.mrb[9].mxu1 }
 0x5fa   :  { %v882_v45 = vadd.f32 %v960_v35, %v881_v44 }
 0x5fb   :  { %913 = vst.msk [vmem:[%s1512_s6 + $0x18] sm:$0xff] %vm45_vm0, %v887_v43 }
 0x5fc   :  { %912 = vst.msk [vmem:[%s1512_s6 + $0x10] sm:$0xff] %vm45_vm0, %v882_v45 }
 0x603   :  { %v1232_v46 = vpop.eup %1231 }
 0x604   :  { %v752_v47 = vadd.f32 1.0, %v1232_v46 }
 0x606   :  { %1233 = vrcp.f32 %v752_v47 }
 0x60e   :  { %v1141_v48 = vpop.f32.mrb[10].mxu1 }
 0x60f   :  { %v897_v49 = vadd.f32 %v1141_v48, %v960_v35  ;;  %v891_v50 = vpop.f32.mrb[11].mxu1 }
 0x610   :  { %v1234_v51 = vpop.eup %1233  ;;  %v892_v52 = vadd.f32 %v960_v35, %v891_v50 }
 0x611   :  { %915 = vst.msk [vmem:[%s1512_s6 + $0x28] sm:$0xff] %vm45_vm0, %v897_v49  ;;  %1142 = vmatprep.mubr.msk.f32.mxu1 %vm45_vm0, %v1234_v51 }
 0x612   :  { %914 = vst.msk [vmem:[%s1512_s6 + $0x20] sm:$0xff] %vm45_vm0, %v892_v52 }
 0x6c2   :  { %v708_v54 = vpop.f32.mrb[14].mxu0 }
 0x6c3   :  { %v709_v55 = vadd.f32 %v708_v54, %v638_v53  ;;  %v1124_v56 = vpop.f32.mrb[15].mxu0 }
 0x6c5   :  { %712 = vst.msk [vmem:[#allocation2 + $0x38] sm:$0xff] %vm45_vm0, %v709_v55  ;;  %713 = vst.msk [vmem:[#allocation3] sm:$0xff] %vm45_vm0, %v709_v55 }
 0x6cc   :  { %v721_v57 = vld [vmem:[#allocation2 + $0x38] sm:$0xff] }
 0x6cd   :  { %v959_v58 = vmul.f32 -1.442695, %v721_v57 }
 0x6cf   :  { %1235 = vpow2.f32 %v959_v58 }
 0x6d9   :  { %v1236_v59 = vpop.eup %1235 }
 0x6da   :  { %v753_v60 = vadd.f32 1.0, %v1236_v59 }
 0x6dc   :  { %1237 = vrcp.f32 %v753_v60 }
 0x6e6   :  { %v1238_v61 = vpop.eup %1237 }
 0x6e7   :  { %1143 = vmatmul.mubr.msk.f32.gmra.mrb[12].mxu1 %vm45_vm0, %v1238_v61 }
 0x6e8   :  { %1250 = shalt.err (!%p1247_p4)
}
 0x6e9   :  { %s1251_s0 = scalar_lea.hbm %s1513_s7, 128 }
 0x6ea   :  { %p1252_p5 = scmp.ne.s32.totalorder %s1513_s7, %s1251_s0  ;;  %p1255_p6 = scmp.lt.u32.totalorder %s1251_s0, %s1513_s7 }
 0x6ec   :  { %p1257_p7 = pnand %p1255_p6, %p1252_p5 }
 0x6ee   :  { %1260 = shalt.err (!%p1257_p7)
}
 0x6ef   :  { %929 = dma.vmem_to_hbm [thread:$0]  %s927_s28, 128, %s1513_s7, [#allocation4]  }
 0x7ba   :  { %v1144_v62 = vpop.f32.mrb[12].mxu1 }
 0x7bb   :  { %v907_v63 = vadd.f32 %v1144_v62, %v960_v35  ;;  %v901_v0 = vpop.f32.mrb[13].mxu1 }
 0x7bc   :  { %v902_v1 = vadd.f32 %v960_v35, %v901_v0 }
 0x7bd   :  { %917 = vst.msk [vmem:[%s1512_s6 + $0x38] sm:$0xff] %vm45_vm0, %v907_v63 }
 0x7be   :  { %916 = vst.msk [vmem:[%s1512_s6 + $0x30] sm:$0xff] %vm45_vm0, %v902_v1 }
 0x7bf   :  { %1261 = dma.done.wait [#allocation4], 128  }
 0x7c0   :  { %1262 = vsyncadd [#allocation4], 4294967168 }
 0x7c1   :  { %935 = vsyncpa [#allocation4], 1 }

</bundles_post_ra>
